<compile_context>
chip_gen: v7x
topology: tpu7x:2x2x1
jax: 0.10.0
libtpu: 0.0.40
codegen_flags: <defaults>
</compile_context>

<pallas_src>
import jax
import jax.numpy as jnp
from jax.experimental import pallas as pl
from jax.experimental.pallas import tpu as pltpu


# -----------------------------------------------------------------------------
# Default path: InitialBridge.forward is `return x`.  A true no-op.
# -----------------------------------------------------------------------------
def initial_bridge(x, mask):
    """Equivalent of InitialBridge.forward(x, mask) -> x.

    The reference forward is the identity on x; emitting a kernel (even an
    aliased one) can only add a defensive copy unless the caller donates x,
    so the default path performs no work at all.
    """
    del mask  # unused by the reference forward
    return x


# -----------------------------------------------------------------------------
# Optional path: materialize a distinct output buffer with an optimized copy.
# -----------------------------------------------------------------------------
def _copy_kernel(x_ref, o_ref):
    o_ref[...] = x_ref[...]


_MAX_LANES = 8192       # widest lane dim searched (keeps trace-time search tiny)
_MIN_GRID_STEPS = 8     # enough steps for DMA overlap + v7x megacore split


def _vmem_budget():
    """(per-block byte cap, vmem_limit_bytes) derived from the chip's VMEM."""
    try:
        vmem_cap = int(pltpu.get_tpu_info().vmem_capacity_bytes)
    except Exception:  # pragma: no cover - interpret mode / CPU tracing
        vmem_cap = 64 * 1024 * 1024
    # Double-buffered input + output => ~4x block bytes resident; keep headroom
    # so even v7x's 64 MiB physical VMEM is comfortable.
    block_cap = min(8 * 1024 * 1024, vmem_cap // 8)
    vmem_limit = min((vmem_cap * 3) // 4, 6 * block_cap)
    return block_cap, vmem_limit


def _sublane_pack(itemsize):
    """Rows per packed sublane group: 8 for f32, 16 for bf16, 32 for int8/fp8."""
    return max(8, 32 // max(1, itemsize))


def _lane_dense_layout(total_padded, pack):
    """Factor total_padded (a multiple of 128) into (rows, lanes).

    Picks the widest multiple-of-128 divisor <= _MAX_LANES that still leaves
    at least _MIN_GRID_STEPS * pack rows for tiling; for tiny arrays it falls
    back to the widest divisor (pipelining is irrelevant there).  Because the
    wrapper pads to a multiple of 128, a legal lane-dense N always exists.
    """
    best = 128
    best_pipelined = None
    cand = 128
    limit = min(total_padded, _MAX_LANES)
    while cand <= limit:
        if total_padded % cand == 0:
            best = cand
            if total_padded // cand >= _MIN_GRID_STEPS * pack:
                best_pipelined = cand
        cand += 128
    n = best_pipelined if best_pipelined is not None else best
    return total_padded // n, n


def _pick_tile_m(m, n, itemsize, pack, block_cap):
    """Largest pack-aligned row tile under block_cap with >= _MIN_GRID_STEPS steps."""
    if m <= pack:
        return m  # full-extent rows: always a legal block shape
    rows_by_bytes = max(pack, ((block_cap // (n * itemsize)) // pack) * pack)
    rows_by_steps = max(pack, (pl.cdiv(m, _MIN_GRID_STEPS) // pack) * pack)
    rows_in_array = max(pack, (m // pack) * pack)
    return min(rows_by_bytes, rows_by_steps, rows_in_array)


def initial_bridge_copy(x, mask):
    """Variant of initial_bridge that writes a distinct output buffer."""
    del mask  # unused by the reference forward
    itemsize = jnp.dtype(x.dtype).itemsize
    pack = _sublane_pack(itemsize)
    block_cap, vmem_limit = _vmem_budget()

    total = x.size
    flat = x.reshape(-1)
    pad = (-total) % 128
    if pad:
        # Lane-dense layout needs a multiple-of-128 element count; pad in the
        # wrapper rather than emitting masked partial stores in the kernel.
        flat = jnp.pad(flat, (0, pad))
    total_p = total + pad

    m, n = _lane_dense_layout(total_p, pack)
    tile_m = _pick_tile_m(m, n, itemsize, pack, block_cap)
    num_blocks = pl.cdiv(m, tile_m)

    x2d = flat.reshape(m, n)
    out2d = pl.pallas_call(
        _copy_kernel,
        out_shape=jax.ShapeDtypeStruct((m, n), x.dtype),
        grid_spec=pl.GridSpec(
            grid=(num_blocks,),
            in_specs=[pl.BlockSpec((tile_m, n), lambda i: (i, 0))],
            out_specs=pl.BlockSpec((tile_m, n), lambda i: (i, 0)),
        ),
        compiler_params=pltpu.CompilerParams(
            dimension_semantics=("parallel",),
            vmem_limit_bytes=vmem_limit,
        ),
        cost_estimate=pl.CostEstimate(
            flops=0,
            transcendentals=0,
            bytes_accessed=2 * total_p * itemsize,
        ),
    )(x2d)

    out_flat = out2d.reshape(-1)
    if pad:
        out_flat = out_flat[:total]
    return out_flat.reshape(x.shape)


if __name__ == "__main__":
    # Small shapes consistent with the module's 5-D input convention.
    B, C, H, W, D = 2, 4, 8, 8, 8

    key = jax.random.PRNGKey(0)
    kx, km = jax.random.split(key)
    x = jax.random.normal(kx, (B, C, H, W, D), dtype=jnp.float32)
    mask = (jax.random.uniform(km, (B, 1, H, W, D)) > 0.5).astype(jnp.float32)

    # Default path: the reference forward is the identity, so no kernel runs.
    out = jax.block_until_ready(initial_bridge(x, mask))
    assert out.shape == x.shape and out.dtype == x.dtype
    assert bool(jnp.array_equal(out, x))

    # Explicit-copy path (Pallas streaming copy into a distinct buffer).
    out_copy = jax.block_until_ready(initial_bridge_copy(x, mask))
    assert out_copy.shape == x.shape and out_copy.dtype == x.dtype
    assert bool(jnp.array_equal(out_copy, x))

    # Exercise the wrapper-padding / ragged-shape path with an awkward shape.
    x2 = jax.random.normal(kx, (2, 3, 5, 7, 9), dtype=jnp.float32)
    mask2 = jnp.ones((2, 1, 5, 7, 9), dtype=jnp.float32)
    out2 = jax.block_until_ready(initial_bridge_copy(x2, mask2))
    assert out2.shape == x2.shape and bool(jnp.array_equal(out2, x2))

    print("KERNEL_OK")
</pallas_src>

<mosaic_0001>
module attributes {stable_mosaic.version = 11 : i64} {
  func.func @_copy_kernel(%arg0: i32, %arg1: memref<1x4096xf32, #tpu.memory_space<vmem>>, %arg2: memref<1x4096xf32, #tpu.memory_space<vmem>>) attributes {dimension_semantics = [#tpu.dimension_semantics<parallel>], iteration_bounds = array<i64: 1>, scalar_prefetch = 0 : i64, scratch_operands = 0 : i64, tpu.core_type = #tpu.core_type<tc>, window_params = [{transform_indices = @transform_0, window_bounds = array<i64: 1, 4096>}, {transform_indices = @transform_1, window_bounds = array<i64: 1, 4096>}]} {
    %c0 = arith.constant 0 : index
    %c0_0 = arith.constant 0 : index
    %0 = vector.load %arg1[%c0, %c0_0] : memref<1x4096xf32, #tpu.memory_space<vmem>>, vector<1x4096xf32>
    %c0_1 = arith.constant 0 : index
    %c0_2 = arith.constant 0 : index
    %1 = vector.load %arg2[%c0_1, %c0_2] : memref<1x4096xf32, #tpu.memory_space<vmem>>, vector<1x4096xf32>
    tpu.vector_store %arg2[%c0_1, %c0_2], %0 {strides = array<i32>} : memref<1x4096xf32, #tpu.memory_space<vmem>>, vector<1x4096xf32>,
    return
  }
  func.func @transform_0(%arg0: i32) -> (i32, i32) {
    %c0_i32 = arith.constant 0 : i32
    %c0_i32_0 = arith.constant 0 : i32
    return %arg0, %c0_i32 : i32, i32
  }
  func.func @transform_1(%arg0: i32) -> (i32, i32) {
    %c0_i32 = arith.constant 0 : i32
    %c0_i32_0 = arith.constant 0 : i32
    return %arg0, %c0_i32 : i32, i32
  }
}

</mosaic_0001>

<bundles_post_ra>
// kernel: tpu_custom_call.1
= control target key start
LH: loop header
LB: loop body
LE: loop exit
PB: predicated region body
PF: predicated region fallthrough
CT: control target
= control target key end

     0   :  { %6 = vsyncpa [#allocation3], 0  ;;  %s130_s0 = inlined_call_operand.hbm [shape: f32[1,4096], index: 0, kind: input, shape index: {}]   ;;  %s131_s1 = inlined_call_operand.hbm [shape: f32[1,4096], index: 1, kind: output, shape index: {}]  }
   0x1   :  { %7 = vsyncpa [#allocation4], 0  ;;  %s94_s6 = smov [#allocation2]   ;;  %s46_s10 = scalar_lea.hbm %s130_s0, 512 }
   0x2   :  { %s14_s7 = sshll.u32 %s94_s6, 4  ;;  %p47_p0 = scmp.ne.s32.totalorder %s130_s0, %s46_s10  ;;  %s15_s7 = int_to_ptr.vmem [resolvable:$true] %s14_s7 }
   0x3   :  { %p50_p1 = scmp.lt.u32.totalorder %s46_s10, %s130_s0 }
   0x5   :  { %p52_p2 = pnand %p50_p1, %p47_p0 }
   0x7   :  { %55 = shalt.err (!%p52_p2)
}
   0x8   :  { %s56_s15 = scalar_lea.vmem %s15_s7, 512  ;;  %p61_p4 = scmp.lt.s32.totalorder %s15_s7, %s15_s7 }
   0x9   :  { %p57_p3 = scmp.ne.s32.totalorder %s15_s7, %s56_s15  ;;  %p62_p5 = scmp.lt.s32.totalorder %s56_s15, %s56_s15 }
   0xb   :  { %p63_p6 = por %p62_p5, %p61_p4 }
   0xd   :  { %p64_p7 = pnand %p63_p6, %p57_p3 }
   0xf   :  { %67 = shalt.err (!%p64_p7)
}
  0x10   :  { %17 = dma.hbm_to_vmem [thread:$0]  %s130_s0, 512, %s15_s7, [#allocation3]  }
  0x11   :  { %90 = dma.done.wait [#allocation3], 512  }
  0x12   :  { %91 = vsyncadd [#allocation3], 4294966784  ;;  %s95_s18 = smov [#allocation5]   ;;  %v21_v0 = vld [vmem:[#allocation2] sm:$0xff]  ;;  %v22_v1 = vld [vmem:[#allocation2 + $0x8] sm:$0xff] }
  0x13   :  { %s35_s19 = sshll.u32 %s95_s18, 4  ;;  %v23_v2 = vld [vmem:[#allocation2 + $0x10] sm:$0xff]  ;;  %25 = vst [vmem:[#allocation5] sm:$0xff] %v21_v0  ;;  %26 = vst [vmem:[#allocation5 + $0x8] sm:$0xff] %v22_v1  ;;  %v24_v3 = vld [vmem:[#allocation2 + $0x18] sm:$0xff]  ;;  %s36_s19 = int_to_ptr.vmem [resolvable:$true] %s35_s19 }
  0x14   :  { %27 = vst [vmem:[#allocation5 + $0x10] sm:$0xff] %v23_v2  ;;  %28 = vst [vmem:[#allocation5 + $0x18] sm:$0xff] %v24_v3  ;;  %s68_s20 = scalar_lea.vmem %s36_s19, 512  ;;  %p73_p9 = scmp.lt.s32.totalorder %s36_s19, %s36_s19 }
  0x15   :  { %p69_p8 = scmp.ne.s32.totalorder %s36_s19, %s68_s20  ;;  %p74_p10 = scmp.lt.s32.totalorder %s68_s20, %s68_s20 }
  0x17   :  { %p75_p11 = por %p74_p10, %p73_p9 }
  0x19   :  { %p76_p12 = pnand %p75_p11, %p69_p8 }
  0x1b   :  { %79 = shalt.err (!%p76_p12)
}
  0x1c   :  { %s80_s22 = scalar_lea.hbm %s131_s1, 512 }
  0x1d   :  { %p81_p13 = scmp.ne.s32.totalorder %s131_s1, %s80_s22  ;;  %p84_p0 = scmp.lt.u32.totalorder %s80_s22, %s131_s1 }
  0x1f   :  { %p86_p1 = pnand %p84_p0, %p81_p13 }
  0x21   :  { %89 = shalt.err (!%p86_p1)
}
  0x22   :  { %38 = dma.vmem_to_hbm [thread:$0]  %s36_s19, 512, %s131_s1, [#allocation4]  }
  0x23   :  { %92 = dma.done.wait [#allocation4], 512  }
  0x24   :  { %93 = vsyncadd [#allocation4], 4294966784 }
  0x25   :  { %42 = vsyncpa [#allocation3], 1 }
  0x26   :  { %43 = vsyncpa [#allocation4], 1 }

</bundles_post_ra>
